<compile_context>
chip_gen: v5e
topology: v5e:2x2
jax: 0.10.0
libtpu: 0.0.40
codegen_flags: <defaults>
</compile_context>

<pallas_src>
import functools

import jax
import jax.numpy as jnp
from jax.experimental import pallas as pl
from jax.experimental.pallas import tpu as pltpu


def _accuracy_kernel(pred_ref, target_ref, out_ref, acc_ref, *, topk, num, tile_n):
    step = pl.program_id(0)

    @pl.when(step == 0)
    def _init():
        acc_ref[...] = jnp.zeros_like(acc_ref)

    pred = pred_ref[...]                      # (TILE_N, C), native dtype
    tgt = target_ref[...]                     # (TILE_N, 1) int32
    tn, c = pred.shape

    # Validity mask: rows past the true batch size (padding / partial block).
    row = jax.lax.broadcasted_iota(jnp.int32, (tn, 1), 0) + step * tile_n
    valid = row < num                         # (TILE_N, 1) bool

    # Target-class score per row via select + max (no one-hot multiply).
    col = jax.lax.broadcasted_iota(jnp.int32, (tn, c), 1)
    tscore = jnp.max(jnp.where(col == tgt, pred, -jnp.inf),
                     axis=1, keepdims=True)   # (TILE_N, 1), pred dtype

    # Rank of the target = number of strictly greater scores in the row.
    rank = jnp.sum((pred > tscore).astype(jnp.int32),
                   axis=1, keepdims=True)     # (TILE_N, 1) int32

    # Per-k correct flags.  topk entries are static Python ints -> no captured
    # array constants (they lower as scalar literals).
    cols = [((rank < k) & valid).astype(jnp.int32) for k in topk]  # (TILE_N, 1) each
    correct = jnp.concatenate(cols, axis=1)                        # (TILE_N, K) int32

    # Accumulate exact int32 counts in a tiny resident VMEM scratch.
    acc_ref[...] += jnp.sum(correct, axis=0, keepdims=True)        # (1, K) int32

    @pl.when(step == pl.num_programs(0) - 1)
    def _finalize():
        out_ref[...] = acc_ref[...].astype(jnp.float32) * (100.0 / num)


def _choose_tile_rows(n_rows, n_cols, dtype):
    """Pick TILE_N (multiple of the sublane packing) and padded N."""
    itemsize = jnp.dtype(dtype).itemsize
    sub = 8 * max(1, 4 // max(1, itemsize))          # 8 (f32), 16 (bf16/f16), 32 (int8)
    budget = 8 * 1024 * 1024                         # ~8 MiB per pred buffer (2x buffered)
    t = budget // max(1, n_cols * itemsize)
    t = max(sub, min(4096, t))
    t = (t // sub) * sub
    n_pad = ((n_rows + sub - 1) // sub) * sub
    t = min(t, n_pad)
    return t, n_pad


def accuracy_pallas(pred, target, topk=(1,)):
    """Top-k accuracy via a tiled, accumulating Pallas TPU kernel.

    pred:   (N, C) float array (any float dtype; streamed natively)
    target: (N,)   int array
    topk:   int or tuple of ints
    Returns a float (if topk is int) or tuple of floats.
    """
    if isinstance(topk, int):
        topk_t = (topk,)
        return_single = True
    else:
        topk_t = tuple(int(k) for k in topk)
        return_single = False

    n, c = pred.shape
    k_out = len(topk_t)

    target2d = target.astype(jnp.int32).reshape(n, 1)

    tile_n, n_pad = _choose_tile_rows(n, c, pred.dtype)
    if n_pad != n:
        # Minimal pad (< one sublane group); padded rows are masked in-kernel.
        pred = jnp.pad(pred, ((0, n_pad - n), (0, 0)))
        target2d = jnp.pad(target2d, ((0, n_pad - n), (0, 0)))

    num_blocks = (n_pad + tile_n - 1) // tile_n

    kernel = functools.partial(_accuracy_kernel, topk=topk_t, num=n, tile_n=tile_n)

    out = pl.pallas_call(
        kernel,
        out_shape=jax.ShapeDtypeStruct((1, k_out), jnp.float32),
        grid=(num_blocks,),
        in_specs=[
            pl.BlockSpec((tile_n, c), lambda i: (i, 0)),
            pl.BlockSpec((tile_n, 1), lambda i: (i, 0)),
        ],
        out_specs=pl.BlockSpec((1, k_out), lambda i: (0, 0)),
        scratch_shapes=[pltpu.VMEM((1, k_out), jnp.int32)],
        compiler_params=pltpu.CompilerParams(
            dimension_semantics=("arbitrary",),
            vmem_limit_bytes=32 * 1024 * 1024,
        ),
    )(pred, target2d)

    res = tuple(out[0, i] for i in range(k_out))
    return res[0] if return_single else res


class Accuracy:
    """JAX/Pallas counterpart of the PyTorch `Accuracy` module."""

    def __init__(self, topk=(1,)):
        self.topk = topk

    def __call__(self, pred, target):
        return accuracy_pallas(pred, target, self.topk)


def _reference_accuracy(pred, target, topk):
    """Pure-jnp reference with identical rank-based semantics."""
    n = pred.shape[0]
    tscore = jnp.take_along_axis(pred, target[:, None].astype(jnp.int32), axis=1)
    rank = jnp.sum(pred > tscore, axis=1)
    return tuple(jnp.sum(rank < k).astype(jnp.float32) * (100.0 / n) for k in topk)


if __name__ == "__main__":
    key = jax.random.PRNGKey(0)
    k1, k2, k3, k4 = jax.random.split(key, 4)

    # Test 1: float32, N a multiple of 8 (single block, no masking needed).
    n, c = 8, 32
    topk = (1, 5)
    pred = jax.random.normal(k1, (n, c), dtype=jnp.float32)
    target = jax.random.randint(k2, (n,), 0, c, dtype=jnp.int32)

    res = Accuracy(topk=topk)(pred, target)
    res = jax.block_until_ready(res)
    ref = _reference_accuracy(pred, target, topk)
    for r, rr in zip(res, ref):
        assert abs(float(r) - float(rr)) < 1e-4, (float(r), float(rr))

    # Test 2: bfloat16 input streamed natively, ragged N (exercises padding +
    # in-kernel row masking).
    n2, c2 = 37, 40
    pred2 = jax.random.normal(k3, (n2, c2), dtype=jnp.bfloat16)
    target2 = jax.random.randint(k4, (n2,), 0, c2, dtype=jnp.int32)

    res2 = Accuracy(topk=(1, 3))(pred2, target2)
    res2 = jax.block_until_ready(res2)
    ref2 = _reference_accuracy(pred2, target2, (1, 3))
    for r, rr in zip(res2, ref2):
        assert abs(float(r) - float(rr)) < 1e-3, (float(r), float(rr))

    print("KERNEL_OK")
</pallas_src>

<mosaic_0001>
module attributes {stable_mosaic.version = 11 : i64} {
  func.func @_accuracy_kernel(%arg0: i32, %arg1: memref<8x32xf32, #tpu.memory_space<vmem>>, %arg2: memref<8x1xi32, #tpu.memory_space<vmem>>, %arg3: memref<1x2xf32, #tpu.memory_space<vmem>>, %arg4: memref<1x2xi32, #tpu.memory_space<vmem>>) attributes {dimension_semantics = [#tpu.dimension_semantics<arbitrary>], iteration_bounds = array<i64: 1>, scalar_prefetch = 0 : i64, scratch_operands = 1 : i64, tpu.core_type = #tpu.core_type<tc>, window_params = [{transform_indices = @transform_0, window_bounds = array<i64: 8, 32>}, {transform_indices = @transform_1, window_bounds = array<i64: 8, 1>}, {pipeline_mode = #tpu.pipeline_mode<synchronous>, transform_indices = @transform_2, window_bounds = array<i64: 1, 2>}]} {
    %c0_i32 = arith.constant 0 : i32
    %0 = arith.cmpi eq, %arg0, %c0_i32 : i32
    %1 = arith.extui %0 : i1 to i32
    %c0_i32_0 = arith.constant 0 : i32
    %2 = arith.cmpi ne, %1, %c0_i32_0 : i32
    scf.if %2 {
      %c0_i32_14 = arith.constant 0 : i32
      %40 = vector.broadcast %c0_i32_14 : i32 to vector<1x2xi32>
      %c0_15 = arith.constant 0 : index
      %c0_16 = arith.constant 0 : index
      %41 = vector.load %arg4[%c0_15, %c0_16] : memref<1x2xi32, #tpu.memory_space<vmem>>, vector<1x2xi32>
      tpu.vector_store %arg4[%c0_15, %c0_16], %40 {strides = array<i32>} : memref<1x2xi32, #tpu.memory_space<vmem>>, vector<1x2xi32>,
    } else {
    }
    %c0 = arith.constant 0 : index
    %c0_1 = arith.constant 0 : index
    %3 = vector.load %arg1[%c0, %c0_1] : memref<8x32xf32, #tpu.memory_space<vmem>>, vector<8x32xf32>
    %c0_2 = arith.constant 0 : index
    %c0_3 = arith.constant 0 : index
    %4 = vector.load %arg2[%c0_2, %c0_3] : memref<8x1xi32, #tpu.memory_space<vmem>>, vector<8x1xi32>
    %5 = tpu.iota {dimensions = array<i32: 0>} : vector<8x1xi32>
    %c8_i32 = arith.constant 8 : i32
    %6 = arith.muli %arg0, %c8_i32 : i32
    %7 = vector.broadcast %6 : i32 to vector<8x1xi32>
    %8 = arith.addi %5, %7 : vector<8x1xi32>
    %c8_i32_4 = arith.constant 8 : i32
    %9 = vector.broadcast %c8_i32_4 : i32 to vector<8x1xi32>
    %10 = arith.cmpi slt, %8, %9 : vector<8x1xi32>
    %11 = tpu.iota {dimensions = array<i32: 1>} : vector<8x32xi32>
    %12 = vector.broadcast %4 : vector<8x1xi32> to vector<8x32xi32>
    %13 = arith.cmpi eq, %11, %12 : vector<8x32xi32>
    %cst = arith.constant 0xFF800000 : f32
    %14 = vector.broadcast %cst : f32 to vector<8x32xf32>
    %15 = arith.select %13, %3, %14 : vector<8x32xi1>, vector<8x32xf32>
    %cst_5 = arith.constant dense<0xFF800000> : vector<8xf32>
    %16 = vector.multi_reduction <maximumf>, %15, %cst_5 [1] : vector<8x32xf32> to vector<8xf32>
    %17 = vector.shape_cast %16 : vector<8xf32> to vector<8x1xf32>
    %18 = vector.broadcast %17 : vector<8x1xf32> to vector<8x32xf32>
    %19 = arith.cmpf ogt, %3, %18 : vector<8x32xf32>
    %20 = arith.extui %19 : vector<8x32xi1> to vector<8x32xi32>
    %cst_6 = arith.constant dense<0> : vector<8xi32>
    %21 = vector.multi_reduction <add>, %20, %cst_6 [1] : vector<8x32xi32> to vector<8xi32>
    %22 = vector.shape_cast %21 : vector<8xi32> to vector<8x1xi32>
    %c1_i32 = arith.constant 1 : i32
    %23 = vector.broadcast %c1_i32 : i32 to vector<8x1xi32>
    %24 = arith.cmpi slt, %22, %23 : vector<8x1xi32>
    %25 = arith.andi %24, %10 : vector<8x1xi1>
    %26 = arith.extui %25 : vector<8x1xi1> to vector<8x1xi32>
    %c5_i32 = arith.constant 5 : i32
    %27 = vector.broadcast %c5_i32 : i32 to vector<8x1xi32>
    %28 = arith.cmpi slt, %22, %27 : vector<8x1xi32>
    %29 = arith.andi %28, %10 : vector<8x1xi1>
    %30 = arith.extui %29 : vector<8x1xi1> to vector<8x1xi32>
    %31 = tpu.concatenate %26, %30 in 1 : vector<8x1xi32>, vector<8x1xi32> -> vector<8x2xi32>
    %c0_7 = arith.constant 0 : index
    %c0_8 = arith.constant 0 : index
    %32 = vector.load %arg4[%c0_7, %c0_8] : memref<1x2xi32, #tpu.memory_space<vmem>>, vector<1x2xi32>
    %cst_9 = arith.constant dense<0> : vector<2xi32>
    %33 = vector.multi_reduction <add>, %31, %cst_9 [0] : vector<8x2xi32> to vector<2xi32>
    %34 = vector.shape_cast %33 : vector<2xi32> to vector<1x2xi32>
    %35 = arith.addi %32, %34 : vector<1x2xi32>
    %c0_10 = arith.constant 0 : index
    %c0_11 = arith.constant 0 : index
    %36 = vector.load %arg4[%c0_10, %c0_11] : memref<1x2xi32, #tpu.memory_space<vmem>>, vector<1x2xi32>
    tpu.vector_store %arg4[%c0_10, %c0_11], %35 {strides = array<i32>} : memref<1x2xi32, #tpu.memory_space<vmem>>, vector<1x2xi32>,
    %c0_i32_12 = arith.constant 0 : i32
    %37 = arith.cmpi eq, %arg0, %c0_i32_12 : i32
    %38 = arith.extui %37 : i1 to i32
    %c0_i32_13 = arith.constant 0 : i32
    %39 = arith.cmpi ne, %38, %c0_i32_13 : i32
    scf.if %39 {
      %c0_14 = arith.constant 0 : index
      %c0_15 = arith.constant 0 : index
      %40 = vector.load %arg4[%c0_14, %c0_15] : memref<1x2xi32, #tpu.memory_space<vmem>>, vector<1x2xi32>
      %41 = arith.sitofp %40 : vector<1x2xi32> to vector<1x2xf32>
      %cst_16 = arith.constant 1.250000e+01 : f32
      %42 = vector.broadcast %cst_16 : f32 to vector<1x2xf32>
      %43 = arith.mulf %41, %42 : vector<1x2xf32>
      %c0_17 = arith.constant 0 : index
      %c0_18 = arith.constant 0 : index
      %44 = vector.load %arg3[%c0_17, %c0_18] : memref<1x2xf32, #tpu.memory_space<vmem>>, vector<1x2xf32>
      tpu.vector_store %arg3[%c0_17, %c0_18], %43 {strides = array<i32>} : memref<1x2xf32, #tpu.memory_space<vmem>>, vector<1x2xf32>,
    } else {
    }
    return
  }
  func.func @transform_0(%arg0: i32) -> (i32, i32) {
    %c0_i32 = arith.constant 0 : i32
    %c0_i32_0 = arith.constant 0 : i32
    return %arg0, %c0_i32 : i32, i32
  }
  func.func @transform_1(%arg0: i32) -> (i32, i32) {
    %c0_i32 = arith.constant 0 : i32
    %c0_i32_0 = arith.constant 0 : i32
    return %arg0, %c0_i32 : i32, i32
  }
  func.func @transform_2(%arg0: i32) -> (i32, i32) {
    %c0_i32 = arith.constant 0 : i32
    %c0_i32_0 = arith.constant 0 : i32
    %c0_i32_1 = arith.constant 0 : i32
    return %c0_i32, %c0_i32_0 : i32, i32
  }
}

</mosaic_0001>

<bundles_post_ra>
// kernel: tpu_custom_call.1
= control target key start
LH: loop header
LB: loop body
LE: loop exit
PB: predicated region body
PF: predicated region fallthrough
CT: control target
= control target key end

     0   :  { %s153_s0 = inlined_call_operand.vmem [shape: f32[8,32], index: 0, kind: input, shape index: {}]   ;;  %s154_s1 = inlined_call_operand.vmem [shape: s32[8,1], index: 1, kind: input, shape index: {}]   ;;  %s155_s2 = inlined_call_operand.hbm [shape: f32[1,2], index: 2, kind: output, shape index: {}]  }
   0x1   :  { %v19_v0 = vld [vmem:[%s154_s1] sm:$0xff] }
   0x2   :  { %7 = vsyncpa [#allocation4], 0  ;;  %v124_v1 = vmov 0   ;;  %v26_v2 = vlaneseq  ;;  %v18_v4 = vld [vmem:[%s153_s0] sm:$0xff]  ;;  %vm33_vm0 = vcmask 261120   ;;  %vm16_vm3 = vcmask 8192  }
   0x3   :  { %97 = vset.pattern.permute.xlu0 %v124_v1  ;;  %17 = vst.msk [vmem:[#allocation2] sm:$0x1] %vm16_vm3, %v124_v1  ;;  %vm58_vm4 = vcmask 7168   ;;  %vm61_vm5 = vcmask 15360   ;;  %s125_s0 = smov [#allocation3]   ;;  %s86_s15 = sshll.u32 %s155_s2, 4  ;;  %s87_s15 = int_to_ptr.hbm [resolvable:$true] %s86_s15 }
   0x4   :  { %29 = vperm.xlu0 %97, %v19_v0   ;;  %v27_v3 = vand.u32 127, %v26_v2  ;;  %s84_s1 = sshll.u32 %s125_s0, 4  ;;  %s85_s1 = int_to_ptr.vmem [resolvable:$true] %s84_s1 }
   0xa   :  { %v60_v30 = vld [vmem:[#allocation2] sm:$0x1] }
  0x76   :  { %v30_v5 = vpop.permute.xlu0 %29 }
  0x77   :  { %vm31_vm1 = vcmp.eq.s32.totalorder %v27_v3, %v30_v5 }
  0x78   :  { %v32_v6 = vsel %vm31_vm1, %v18_v4, -inf }
  0x79   :  { %v34_v7 = vsel %vm33_vm0, %v32_v6, -inf }
  0x7a   :  { %35 = vmax.xlane.f32.xlu0 %v34_v7 }
  0xed   :  { %v36_v8 = vpop.xlane.xlu0 %35 }
  0xee   :  { %vm37_vm2 = vcmp.gt.f32.partialorder %v18_v4, %v36_v8 }
  0xef   :  { %v38_v9 = vsel %vm37_vm2, 1, %v124_v1 }
  0xf0   :  { %v39_v10 = vsel %vm33_vm0, %v38_v9, 0 }
  0xf1   :  { %v41_v11 = vshrl.u32 %v39_v10, 16  ;;  %v40_v13 = vand.u32 65535, %v39_v10 }
  0xf3   :  { %v43_v12 = vcvt.s32.f32 %v41_v11  ;;  %v42_v14 = vcvt.s32.f32 %v40_v13 }
  0xf5   :  { %46 = vadd.xlane.f32.xlu1 %v43_v12 }
  0xfd   :  { %44 = vadd.xlane.f32.xlu1 %v42_v14 }
 0x168   :  { %v47_v15 = vpop.xlane.xlu1 %46 }
 0x169   :  { %v49_v16 = vcvt.f32.s32 %v47_v15 }
 0x16b   :  { %v50_v18 = vshll.u32 %v49_v16, 16 }
 0x170   :  { %v45_v17 = vpop.xlane.xlu1 %44 }
 0x171   :  { %v48_v19 = vcvt.f32.s32 %v45_v17 }
 0x173   :  { %v51_v20 = vadd.s32 %v50_v18, %v48_v19 }
 0x175   :  { %vm52_vm6 = vcmp.lt.s32.totalorder %v51_v20, 1  ;;  %vm55_vm7 = vcmp.lt.s32.totalorder %v51_v20, 5 }
 0x176   :  { %v54_v21 = vsel %vm52_vm6, 1, %v124_v1  ;;  %v57_v22 = vsel %vm55_vm7, 1, %v124_v1 }
 0x177   :  { %v59_v23 = vsel %vm58_vm4, %v54_v21, %v57_v22 }
 0x178   :  { %v62_v24 = vsel %vm61_vm5, %v59_v23, 0 }
 0x179   :  { %v63_v25 = vrot.slane %v62_v24, 4 }
 0x17b   :  { %v64_v26 = vadd.s32 %v63_v25, %v62_v24 }
 0x17d   :  { %v65_v27 = vrot.slane %v64_v26, 2 }
 0x17f   :  { %v66_v28 = vadd.s32 %v65_v27, %v64_v26 }
 0x181   :  { %v67_v29 = vrot.slane %v66_v28, 1 }
 0x183   :  { %v68_v31 = vadd.s32 %v67_v29, %v66_v28 }
 0x185   :  { %v69_v32 = vadd.s32 %v68_v31, %v60_v30 }
 0x187   :  { %71 = vst.msk [vmem:[#allocation2] sm:$0x1] %vm16_vm3, %v69_v32 }
 0x18e   :  { %v75_v33 = vld [vmem:[#allocation2] sm:$0x1] }
 0x18f   :  { %v76_v34 = vcvt.s32.f32 %v75_v33 }
 0x191   :  { %v77_v35 = vmul.f32 12.5, %v76_v34 }
 0x193   :  { %78 = vst.msk [vmem:[#allocation3] sm:$0x1] %vm16_vm3, %v77_v35 }
 0x194   :  { %89 = dma.vmem_to_hbm [thread:$0]  %s85_s1, 16, %s87_s15, [#allocation4]  }
 0x195   :  { %122 = dma.done.wait [#allocation4], 16  }
 0x196   :  { %123 = vsyncadd [#allocation4], 4294967280 }
 0x197   :  { %94 = vsyncpa [#allocation4], 1 }

</bundles_post_ra>
